<compile_context>
chip_gen: v6e
topology: v6e:2x2x1
jax: 0.10.0
libtpu: 0.0.40
codegen_flags: <defaults>
</compile_context>

<pallas_src>
import math

import jax
import jax.numpy as jnp
from jax.experimental import pallas as pl
from jax.experimental.pallas import tpu as pltpu


# ---------------------------------------------------------------------------
# Pallas kernel: one grid step == one image x one channel tile
# ---------------------------------------------------------------------------
def _bilinear_kernel(x_ref, ah_ref, awt_ref, o_ref):
    """
    x_ref:   (1, tc, H, W)          input channel-tile block
    ah_ref:  (H_out, H)             row-interpolation matrix (VMEM-resident)
    awt_ref: (W, W_out)             column-interpolation matrix, transposed
    o_ref:   (1, tc, H_out, W_out)  output channel-tile block
    """
    tc = x_ref.shape[1]
    h = x_ref.shape[2]
    h_out = ah_ref.shape[0]

    # ---- W pass: ONE batched MXU matmul over all tc*H rows ----------------
    # (1, tc, H, W) -> (tc*H, W) only merges leading dims (free when H % 8 == 0).
    x2d = x_ref[...].reshape(tc * h, x_ref.shape[3])
    t = jnp.dot(x2d, awt_ref[...], preferred_element_type=jnp.float32)  # (tc*H, W_out)

    # ---- H pass: per-channel, loop bounded by the small channel tile ------
    ah = ah_ref[...]
    for c in range(tc):  # static & VMEM-budgeted (tc small), so unrolling is cheap
        y = jnp.dot(ah, t[c * h:(c + 1) * h, :], preferred_element_type=jnp.float32)
        o_ref[0, c] = y.astype(o_ref.dtype)


# ---------------------------------------------------------------------------
# Interpolation matrix (align_corners=True)
# ---------------------------------------------------------------------------
def _interp_matrix(in_size, out_size, dtype=jnp.float32):
    """A (out_size, in_size) matrix s.t. A @ v bilinearly resizes v (align_corners=True)."""
    if out_size == 1:
        src = jnp.zeros((1,), jnp.float32)
    else:
        src = jnp.arange(out_size, dtype=jnp.float32) * (in_size - 1) / (out_size - 1)
    lo = jnp.clip(jnp.floor(src).astype(jnp.int32), 0, in_size - 1)
    hi = jnp.minimum(lo + 1, in_size - 1)
    frac = src - lo.astype(jnp.float32)
    cols = jnp.arange(in_size)
    a = ((cols[None, :] == lo[:, None]).astype(jnp.float32) * (1.0 - frac)[:, None]
         + (cols[None, :] == hi[:, None]).astype(jnp.float32) * frac[:, None])
    return a.astype(dtype)


# ---------------------------------------------------------------------------
# Channel-tile selection: largest divisor of C whose working set fits VMEM
# ---------------------------------------------------------------------------
def _pick_channel_tile(c, h, w, h_out, w_out, itemsize,
                       budget_bytes=16 * 1024 * 1024):
    for tc in range(c, 0, -1):
        if c % tc:
            continue
        in_blk = tc * h * w * itemsize
        out_blk = tc * h_out * w_out * itemsize
        interm = tc * h * w_out * 4                      # f32 W-pass intermediate
        mats = 4 * (h_out * h + w * w_out)               # resident Ah / Aw^T
        # input & output blocks are double-buffered by the BlockSpec pipeline
        if 2 * (in_blk + out_blk) + interm + mats <= budget_bytes:
            return tc
    return 1


# ---------------------------------------------------------------------------
# Wrapper
# ---------------------------------------------------------------------------
def bilinear_upsample(x, scale_factor):
    """x: (N, C, H, W) -> (N, C, floor(H*s), floor(W*s)), bilinear, align_corners=True."""
    n, c, h, w = x.shape
    if isinstance(scale_factor, (tuple, list)):
        sh, sw = scale_factor
    else:
        sh = sw = scale_factor
    h_out = int(math.floor(h * sh))
    w_out = int(math.floor(w * sw))

    ah = _interp_matrix(h, h_out)          # (H_out, H)
    awt = _interp_matrix(w, w_out).T       # (W, W_out)

    itemsize = jnp.dtype(x.dtype).itemsize
    tc = _pick_channel_tile(c, h, w, h_out, w_out, itemsize)
    grid = (n, c // tc)

    flops = 2 * n * c * (h * w * w_out + h_out * h * w_out)
    bytes_accessed = (itemsize * (x.size + n * c * h_out * w_out)
                      + 4 * (ah.size + awt.size))

    return pl.pallas_call(
        _bilinear_kernel,
        out_shape=jax.ShapeDtypeStruct((n, c, h_out, w_out), x.dtype),
        grid=grid,
        in_specs=[
            pl.BlockSpec((1, tc, h, w), lambda i, j: (i, j, 0, 0)),
            pl.BlockSpec((h_out, h), lambda i, j: (0, 0)),   # resident across grid
            pl.BlockSpec((w, w_out), lambda i, j: (0, 0)),   # resident across grid
        ],
        out_specs=pl.BlockSpec((1, tc, h_out, w_out), lambda i, j: (i, j, 0, 0)),
        compiler_params=pltpu.CompilerParams(
            dimension_semantics=("parallel", "parallel"),
            vmem_limit_bytes=32 * 1024 * 1024,
        ),
        cost_estimate=pl.CostEstimate(
            flops=flops, transcendentals=0, bytes_accessed=bytes_accessed),
    )(x, ah, awt)


# ---------------------------------------------------------------------------
# Independent (gather-based) reference for correctness checking
# ---------------------------------------------------------------------------
def _reference_bilinear(x, scale_factor):
    n, c, h, w = x.shape
    if isinstance(scale_factor, (tuple, list)):
        sh, sw = scale_factor
    else:
        sh = sw = scale_factor
    ho = int(math.floor(h * sh))
    wo = int(math.floor(w * sw))

    def coords(insz, outsz):
        if outsz == 1:
            return jnp.zeros((1,), jnp.float32)
        return jnp.arange(outsz, dtype=jnp.float32) * (insz - 1) / (outsz - 1)

    ys, xs = coords(h, ho), coords(w, wo)
    y0 = jnp.clip(jnp.floor(ys).astype(jnp.int32), 0, h - 1)
    x0 = jnp.clip(jnp.floor(xs).astype(jnp.int32), 0, w - 1)
    y1 = jnp.minimum(y0 + 1, h - 1)
    x1 = jnp.minimum(x0 + 1, w - 1)
    fy = (ys - y0.astype(jnp.float32))[:, None]   # (ho, 1)
    fx = (xs - x0.astype(jnp.float32))[None, :]   # (1, wo)

    def g(yi, xi):
        return x[:, :, yi[:, None], xi[None, :]]  # (n, c, ho, wo)

    top = g(y0, x0) * (1.0 - fx) + g(y0, x1) * fx
    bot = g(y1, x0) * (1.0 - fx) + g(y1, x1) * fx
    return top * (1.0 - fy) + bot * fy


if __name__ == "__main__":
    # Small, module-consistent shapes: batch=2, channels=4, 16x16 -> 32x32.
    key = jax.random.PRNGKey(0)
    x = jax.random.normal(key, (2, 4, 16, 16), dtype=jnp.float32)
    scale = 2

    out = bilinear_upsample(x, scale)
    jax.block_until_ready(out)

    assert out.shape == (2, 4, 32, 32)
    ref = _reference_bilinear(x, scale)
    max_err = float(jnp.max(jnp.abs(out - ref)))
    assert max_err < 1e-5, f"mismatch vs reference: max abs err = {max_err}"

    print("KERNEL_OK")
</pallas_src>

<mosaic_0001>
module attributes {stable_mosaic.version = 11 : i64} {
  func.func @_bilinear_kernel(%arg0: i32, %arg1: i32, %arg2: memref<1x4x16x16xf32, #tpu.memory_space<vmem>>, %arg3: memref<32x16xf32, #tpu.memory_space<vmem>>, %arg4: memref<16x32xf32, #tpu.memory_space<vmem>>, %arg5: memref<1x4x32x32xf32, #tpu.memory_space<vmem>>) attributes {dimension_semantics = [#tpu.dimension_semantics<parallel>, #tpu.dimension_semantics<parallel>], iteration_bounds = array<i64: 2, 1>, scalar_prefetch = 0 : i64, scratch_operands = 0 : i64, tpu.core_type = #tpu.core_type<tc>, window_params = [{transform_indices = @transform_0, window_bounds = array<i64: 1, 4, 16, 16>}, {pipeline_mode = #tpu.pipeline_mode<synchronous>, transform_indices = @transform_1, window_bounds = array<i64: 32, 16>}, {pipeline_mode = #tpu.pipeline_mode<synchronous>, transform_indices = @transform_2, window_bounds = array<i64: 16, 32>}, {transform_indices = @transform_3, window_bounds = array<i64: 1, 4, 32, 32>}]} {
    %c0 = arith.constant 0 : index
    %c0_0 = arith.constant 0 : index
    %c0_1 = arith.constant 0 : index
    %c0_2 = arith.constant 0 : index
    %0 = vector.load %arg2[%c0, %c0_0, %c0_1, %c0_2] : memref<1x4x16x16xf32, #tpu.memory_space<vmem>>, vector<1x4x16x16xf32>
    %1 = vector.shape_cast %0 : vector<1x4x16x16xf32> to vector<64x16xf32>
    %c0_3 = arith.constant 0 : index
    %c0_4 = arith.constant 0 : index
    %2 = vector.load %arg4[%c0_3, %c0_4] : memref<16x32xf32, #tpu.memory_space<vmem>>, vector<16x32xf32>
    %cst = arith.constant dense<0.000000e+00> : vector<64x32xf32>
    %3 = tpu.matmul %1, %2, %cst {dimension_numbers = #tpu.dot_dimension_numbers<[1], [0], [0], [1], [0, 0, 1, 1], [], []>} : vector<64x16xf32>, vector<16x32xf32>, vector<64x32xf32> -> vector<64x32xf32>
    %c0_5 = arith.constant 0 : index
    %c0_6 = arith.constant 0 : index
    %4 = vector.load %arg3[%c0_5, %c0_6] : memref<32x16xf32, #tpu.memory_space<vmem>>, vector<32x16xf32>
    %5 = vector.extract_strided_slice %3 {offsets = [0, 0], sizes = [16, 32], strides = [1, 1]} : vector<64x32xf32> to vector<16x32xf32>
    %cst_7 = arith.constant dense<0.000000e+00> : vector<32x32xf32>
    %6 = tpu.matmul %4, %5, %cst_7 {dimension_numbers = #tpu.dot_dimension_numbers<[1], [0], [0], [1], [0, 0, 1, 1], [], []>} : vector<32x16xf32>, vector<16x32xf32>, vector<32x32xf32> -> vector<32x32xf32>
    %c0_8 = arith.constant 0 : index
    %c0_9 = arith.constant 0 : index
    %c0_10 = arith.constant 0 : index
    %c0_11 = arith.constant 0 : index
    %7 = vector.load %arg5[%c0_8, %c0_9, %c0_10, %c0_11] : memref<1x4x32x32xf32, #tpu.memory_space<vmem>>, vector<1x1x32x32xf32>
    %8 = vector.shape_cast %7 : vector<1x1x32x32xf32> to vector<32x32xf32>
    %9 = vector.shape_cast %6 : vector<32x32xf32> to vector<1x1x32x32xf32>
    tpu.vector_store %arg5[%c0_8, %c0_9, %c0_10, %c0_11], %9 {strides = array<i32>} : memref<1x4x32x32xf32, #tpu.memory_space<vmem>>, vector<1x1x32x32xf32>,
    %10 = vector.extract_strided_slice %3 {offsets = [16, 0], sizes = [16, 32], strides = [1, 1]} : vector<64x32xf32> to vector<16x32xf32>
    %cst_12 = arith.constant dense<0.000000e+00> : vector<32x32xf32>
    %11 = tpu.matmul %4, %10, %cst_12 {dimension_numbers = #tpu.dot_dimension_numbers<[1], [0], [0], [1], [0, 0, 1, 1], [], []>} : vector<32x16xf32>, vector<16x32xf32>, vector<32x32xf32> -> vector<32x32xf32>
    %c0_13 = arith.constant 0 : index
    %c1 = arith.constant 1 : index
    %c0_14 = arith.constant 0 : index
    %c0_15 = arith.constant 0 : index
    %12 = vector.load %arg5[%c0_13, %c1, %c0_14, %c0_15] : memref<1x4x32x32xf32, #tpu.memory_space<vmem>>, vector<1x1x32x32xf32>
    %13 = vector.shape_cast %12 : vector<1x1x32x32xf32> to vector<32x32xf32>
    %14 = vector.shape_cast %11 : vector<32x32xf32> to vector<1x1x32x32xf32>
    tpu.vector_store %arg5[%c0_13, %c1, %c0_14, %c0_15], %14 {strides = array<i32>} : memref<1x4x32x32xf32, #tpu.memory_space<vmem>>, vector<1x1x32x32xf32>,
    %15 = vector.extract_strided_slice %3 {offsets = [32, 0], sizes = [16, 32], strides = [1, 1]} : vector<64x32xf32> to vector<16x32xf32>
    %cst_16 = arith.constant dense<0.000000e+00> : vector<32x32xf32>
    %16 = tpu.matmul %4, %15, %cst_16 {dimension_numbers = #tpu.dot_dimension_numbers<[1], [0], [0], [1], [0, 0, 1, 1], [], []>} : vector<32x16xf32>, vector<16x32xf32>, vector<32x32xf32> -> vector<32x32xf32>
    %c0_17 = arith.constant 0 : index
    %c2 = arith.constant 2 : index
    %c0_18 = arith.constant 0 : index
    %c0_19 = arith.constant 0 : index
    %17 = vector.load %arg5[%c0_17, %c2, %c0_18, %c0_19] : memref<1x4x32x32xf32, #tpu.memory_space<vmem>>, vector<1x1x32x32xf32>
    %18 = vector.shape_cast %17 : vector<1x1x32x32xf32> to vector<32x32xf32>
    %19 = vector.shape_cast %16 : vector<32x32xf32> to vector<1x1x32x32xf32>
    tpu.vector_store %arg5[%c0_17, %c2, %c0_18, %c0_19], %19 {strides = array<i32>} : memref<1x4x32x32xf32, #tpu.memory_space<vmem>>, vector<1x1x32x32xf32>,
    %20 = vector.extract_strided_slice %3 {offsets = [48, 0], sizes = [16, 32], strides = [1, 1]} : vector<64x32xf32> to vector<16x32xf32>
    %cst_20 = arith.constant dense<0.000000e+00> : vector<32x32xf32>
    %21 = tpu.matmul %4, %20, %cst_20 {dimension_numbers = #tpu.dot_dimension_numbers<[1], [0], [0], [1], [0, 0, 1, 1], [], []>} : vector<32x16xf32>, vector<16x32xf32>, vector<32x32xf32> -> vector<32x32xf32>
    %c0_21 = arith.constant 0 : index
    %c3 = arith.constant 3 : index
    %c0_22 = arith.constant 0 : index
    %c0_23 = arith.constant 0 : index
    %22 = vector.load %arg5[%c0_21, %c3, %c0_22, %c0_23] : memref<1x4x32x32xf32, #tpu.memory_space<vmem>>, vector<1x1x32x32xf32>
    %23 = vector.shape_cast %22 : vector<1x1x32x32xf32> to vector<32x32xf32>
    %24 = vector.shape_cast %21 : vector<32x32xf32> to vector<1x1x32x32xf32>
    tpu.vector_store %arg5[%c0_21, %c3, %c0_22, %c0_23], %24 {strides = array<i32>} : memref<1x4x32x32xf32, #tpu.memory_space<vmem>>, vector<1x1x32x32xf32>,
    return
  }
  func.func @transform_0(%arg0: i32, %arg1: i32) -> (i32, i32, i32, i32) {
    %c0_i32 = arith.constant 0 : i32
    %c0_i32_0 = arith.constant 0 : i32
    %c0_i32_1 = arith.constant 0 : i32
    return %arg0, %arg1, %c0_i32, %c0_i32_0 : i32, i32, i32, i32
  }
  func.func @transform_1(%arg0: i32, %arg1: i32) -> (i32, i32) {
    %c0_i32 = arith.constant 0 : i32
    %c0_i32_0 = arith.constant 0 : i32
    %c0_i32_1 = arith.constant 0 : i32
    return %c0_i32, %c0_i32_0 : i32, i32
  }
  func.func @transform_2(%arg0: i32, %arg1: i32) -> (i32, i32) {
    %c0_i32 = arith.constant 0 : i32
    %c0_i32_0 = arith.constant 0 : i32
    %c0_i32_1 = arith.constant 0 : i32
    return %c0_i32, %c0_i32_0 : i32, i32
  }
  func.func @transform_3(%arg0: i32, %arg1: i32) -> (i32, i32, i32, i32) {
    %c0_i32 = arith.constant 0 : i32
    %c0_i32_0 = arith.constant 0 : i32
    %c0_i32_1 = arith.constant 0 : i32
    return %arg0, %arg1, %c0_i32, %c0_i32_0 : i32, i32, i32, i32
  }
}

</mosaic_0001>

<bundles_post_ra>
// kernel: tpu_custom_call.1
= control target key start
LH: loop header
LB: loop body
LE: loop exit
PB: predicated region body
PF: predicated region fallthrough
CT: control target
= control target key end

     0   :  { %8 = vsyncpa [#allocation3], 0  ;;  %s1399_s0 = inlined_call_operand.hbm [shape: f32[2,4,16,16], index: 0, kind: input, shape index: {}]   ;;  %s1400_s1 = inlined_call_operand.vmem [shape: f32[32,16], index: 1, kind: input, shape index: {}]   ;;  %s1401_s2 = inlined_call_operand.vmem [shape: f32[16,32], index: 2, kind: input, shape index: {}]   ;;  %s1402_s3 = inlined_call_operand.hbm [shape: f32[2,4,32,32], index: 3, kind: output, shape index: {}]  }
   0x1   :  { %10 = vsyncpa [#allocation3 + $0x1], 0 }
   0x2   :  { %11 = vsyncpa [#allocation4], 0 }
   0x3   :  { %13 = vsyncpa [#allocation4 + $0x1], 0  ;;  %s1175_s12 = smov 0   ;;  %s1177_s13 = smov 0  }
   0x4   :  { %s1179_s14 = smov 0   ;;  %s1181_s15 = smov 0  }
   0x5   :  { %s1183_s16 = smov 0   ;;  %s1185_s17 = smov 0  }
   0x6 LB: > { %s830_s18 = sadd.s32 4294967295, %s1147_s17   ;;  %s831_s19 = sadd.s32 4294967294, %s1147_s17   ;;  %s1147_s17 = sphi %s1185_s17, %s19_s17   ;;  %s1143_s16 = sphi %s1183_s16, %s1413_s16   ;;  %s1139_s15 = sphi %s1181_s15, %s1412_s15   ;;  %s1135_s14 = sphi %s1179_s14, %s1411_s14   ;;  %s1131_s13 = sphi %s1177_s13, %s1410_s13   ;;  %s1127_s12 = sphi %s1175_s12, %s1409_s12  }
   0x7   : > { %s31_s20 = sadd.s32 1, %s1143_s16  ;;  %s40_s21 = sadd.s32 1, %s1135_s14 }
   0x8   : > { %p33_p0 = scmp.ge.s32.totalorder %s31_s20, 2  ;;  %p47_p1 = scmp.ne.s32.totalorder %s1135_s14, %s1131_s13 }
   0x9   : > { %p48_p2 = scmp.eq.s32.totalorder %s1147_s17, 0  ;;  %p53_p3 = scmp.ne.s32.totalorder %s1131_s13, %s1127_s12 }
   0xa   : > { %s1415_s20 = smov (%p33_p0, %s31_s20), 0  ;;  %p54_p5 = scmp.eq.s32.totalorder %s830_s18, 0 }
   0xb   : > { %p1216_p4 = por %p48_p2, %p47_p1  ;;  %s35_s23 = ssub.s32 %s1143_s16, %s1415_s20 }
   0xc   : > { %p121_p6 = scmp.eq.s32.totalorder %s830_s18, 1  ;;  %p38_p7 = scmp.eq.s32.totalorder %s35_s23, 0 }
   0xd   : > { %p1222_p8 = por %p54_p5, %p53_p3  ;;  %p127_p10 = scmp.eq.s32.totalorder %s831_s19, 1 }
   0xe   : > { %p1226_p9 = por %p121_p6, %p47_p1  ;;  %p985_p13 = scmp.lt.s32.totalorder %s1147_s17, 2 }
   0xf   : > { %s1231_s26 = scalar_select %p38_p7, %s1135_s14, %s40_s21  }
  0x10   : > { %p1233_p11 = por %p127_p10, %p53_p3  ;;  %s153_s28 = sand.u32 1, %s1135_s14  }
  0x11   : > { %s834_s29 = sshll.u32 %s153_s28, 6  ;;  %s881_s30 = sshll.u32 %s1143_s16, 10 }
  0x12   : > { %s166_s6 = scalar_lea.hbm %s1399_s0, %s881_s30  ;;  %s157_s7 = scalar_lea.vmem [#allocation2], %s834_s29 }
  0x13   : > { %s167_s8 = sshll.u32 %s157_s7, 4  ;;  %p1246_p0 = pnand %p985_p13, %p1216_p4  ;;  %s168_s8 = int_to_ptr.vmem [resolvable:$true] %s167_s8 }
  0x14   : > { %p837_p1 = scmp.ge.s32.totalorder %s1147_s17, 1  ;;  %s154_s10 = scalar_lea.sflag [#allocation3], %s153_s28 }
  0x15   : > { %p1041_p2 = pneg %p1246_p0  ;;  %s1052_s11 = scalar_lea.vmem %s168_s8, 1024 }
  0x16   : > { %p1053_p3 = scmp.ne.s32.totalorder %s168_s8, %s1052_s11  ;;  %s1149_s18 = smov [#allocation2]  }
  0x17   : > { %s1057_s19 = sshll.u32 %s1149_s18, 4  ;;  %s1058_s19 = int_to_ptr.vmem [resolvable:$false] %s1057_s19 }
  0x18   : > { %p1055_p5 = pnand %p1053_p3, %p1041_p2  ;;  %s1059_s21 = scalar_lea.vmem %s1058_s19, 2048 }
  0x19   : > { %p1060_p7 = scmp.lt.s32.totalorder %s168_s8, %s1058_s19  ;;  %p1061_p10 = scmp.lt.s32.totalorder %s1059_s21, %s1052_s11 }
  0x1a   : > { %p1056_p6 = pneg %p1055_p5 }
  0x1b   : > { %p1062_p12 = por %p1061_p10, %p1060_p7 }
  0x1d   : > { %p1063_p4 = pnand %p1062_p12, %p1056_p6 }
  0x1f   : > { %1066 = shalt.err (!%p1063_p4)
}
  0x20   : > { %s1150_s22 = smov 128   ;;  %s1151_s23 = smov 8  }
  0x21   : > { %980 = dma.hbm_to_vmem [thread:$0]  (!%p1246_p0), %s166_s6, 1024, %s168_s8, %s154_s10, %s1150_s22, %s1150_s22, %s1151_s23  }
  0x22   : > { %p175_p13 = scmp.lt.s32.totalorder %s1147_s17, 3 }
  0x24   : > { %p176_p2 = pnand %p837_p1, %p175_p13 }
  0x25   : > { %s1259_s28 = sand.u32 (!%p176_p2), 1, %s1131_s13  }
  0x26   : > { %179 = sbr.rel (%p176_p2) target bundleno = 475 (0x1db), region = 32  ;;  %s838_s29 = sshll.u32 (!%p176_p2), %s1259_s28, 6 }
  0x27   : > { %s182_s30 = scalar_lea.sflag (!%p176_p2), [#allocation3], %s1259_s28  ;;  %s185_s4 = scalar_lea.vmem (!%p176_p2), [#allocation2], %s838_s29 }
  0x2b   : > { %1118 = dma.done.wait (%p1222_p8), %s182_s30, 1024  }
  0x2c   : > { %1120 = vsyncadd (%p1222_p8), %s182_s30, 4294966272  ;;  %vm220_vm0 = vcmask 130048   ;;  %v219_v0 = vld [vmem:[%s1401_s2 + $0x8] sm:$0xff]  ;;  %v218_v1 = vld [vmem:[%s1401_s2] sm:$0xff]  ;;  %s839_s23 = sshll.u32 %s1259_s28, 7  ;;  %vm451_vm1 = vcmask 261120  }
  0x2d   : > { %v210_v2 = vld [vmem:[%s185_s4] sm:$0xff]  ;;  %917 = vmatprep.subr.mxu0 %v219_v0  ;;  %v211_v3 = vld [vmem:[%s185_s4 + $0x8] sm:$0xff]  ;;  %v212_v4 = vld [vmem:[%s185_s4 + $0x10] sm:$0xff]  ;;  %s1310_s29 = scalar_lea.vmem [#allocation5], %s839_s23  ;;  %s882_s30 = sshll.u32 %s1139_s15, 11 }
  0x2e   : > { %921 = vmatprep.mubr.msk.f32.mxu0 %vm220_vm0, %v210_v2  ;;  %918 = vmatpush3.msra.mxu0 %v219_v0  ;;  %v213_v5 = vld [vmem:[%s185_s4 + $0x18] sm:$0xff]  ;;  %v214_v6 = vld [vmem:[%s185_s4 + $0x20] sm:$0xff]  ;;  %v215_v7 = vld [vmem:[%s185_s4 + $0x28] sm:$0xff]  ;;  %s1345_s7 = scalar_lea.hbm %s1402_s3, %s882_s30  ;;  %s727_s15 = scalar_lea.sflag [#allocation4], %s1259_s28 }
  0x2f   : > { %919 = vmatprep.subr.mxu0 %v218_v1  ;;  %v216_v8 = vld [vmem:[%s185_s4 + $0x30] sm:$0xff]  ;;  %v217_v9 = vld [vmem:[%s185_s4 + $0x38] sm:$0xff]  ;;  %v350_v10 = vld [vmem:[%s1400_s1] sm:$0xff]  ;;  %s743_s4 = sshll.u32 %s1310_s29, 4  ;;  %s1152_s24 = smov [#allocation5]   ;;  %s1347_s4 = int_to_ptr.vmem [resolvable:$true] %s743_s4 }
  0x30   : > { %920 = vmatpush3.msra.mxu0 %v218_v1  ;;  %937 = vmatprep.mubr.msk.f32.mxu1 %vm220_vm0, %v350_v10  ;;  %v351_v13 = vld [vmem:[%s1400_s1 + $0x8] sm:$0xff]  ;;  %v352_v14 = vld [vmem:[%s1400_s1 + $0x10] sm:$0xff]  ;;  %v353_v17 = vld [vmem:[%s1400_s1 + $0x18] sm:$0xff]  ;;  %s1067_s8 = scalar_lea.vmem %s1347_s4, 2048  ;;  %s1071_s9 = sshll.u32 %s1152_s24, 4  ;;  %s1072_s9 = int_to_ptr.vmem [resolvable:$false] %s1071_s9 }
  0x31   : > { %922 = vmatmul.mubr.msk.f32.vlgmr.msra.gmra.mxu0 %vm220_vm0, %v211_v3  ;;  %p1068_p8 = scmp.ne.s32.totalorder %s1347_s4, %s1067_s8  ;;  %s1073_s10 = scalar_lea.vmem %s1072_s9, 4096 }
  0x32   : > { %924 = vmatprep.mubr.msk.f32.mxu0 %vm220_vm0, %v212_v4  ;;  %p1074_p1 = scmp.lt.s32.totalorder %s1347_s4, %s1072_s9  ;;  %p1075_p3 = scmp.lt.s32.totalorder %s1073_s10, %s1067_s8 }
  0x33   : > { %p1069_p12 = pnand %p1068_p8, %p1226_p9 }
  0x34   : > { %p1076_p5 = por %p1075_p3, %p1074_p1 }
  0x35   : > { %925 = vmatmul.mubr.msk.f32.gmra.mxu0 %vm220_vm0, %v213_v5  ;;  %p1070_p0 = pneg %p1069_p12 }
  0x36   : > { %927 = vmatprep.mubr.msk.f32.mxu0 %vm220_vm0, %v214_v6 }
  0x37   : > { %p1077_p6 = pnand %p1076_p5, %p1070_p0 }
  0x39   : > { %928 = vmatmul.mubr.msk.f32.gmra.mxu0 %vm220_vm0, %v215_v7 }
  0x3a   : > { %930 = vmatprep.mubr.msk.f32.mxu0 %vm220_vm0, %v216_v8 }
  0x3d   : > { %931 = vmatmul.mubr.msk.f32.gmra.mxu0 %vm220_vm0, %v217_v9 }
  0x3e   : > { %957 = vmatprep.mubr.msk.f32.mxu0 %vm220_vm0, %v350_v10 }
  0xf1   : > { %v923_v11 = vpop.f32.mrf.mxu0 }
  0xf2   : > { %933 = vmatprep.subr.mxu1 %v923_v11 }
  0xf3   : > { %v311_v12 = vpop.f32.mrf.mxu0  ;;  %934 = vmatpush3.msra.mxu1 %v923_v11 }
  0xf4   : > { %935 = vmatprep.subr.mxu1 %v311_v12 }
  0xf5   : > { %v926_v15 = vpop.f32.mrf.mxu0  ;;  %936 = vmatpush3.msra.mxu1 %v311_v12 }
  0xf6   : > { %943 = vmatprep.subr.mxu1 %v926_v15  ;;  %938 = vmatmul.mubr.msk.f32.vlgmr.msra.gmra.mxu1 %vm220_vm0, %v351_v13 }
  0xf7   : > { %v321_v16 = vpop.f32.mrf.mxu0  ;;  %944 = vmatpush3.msra.mxu1 %v926_v15  ;;  %940 = vmatprep.mubr.msk.f32.mxu1 %vm220_vm0, %v352_v14 }
  0xf8   : > { %945 = vmatprep.subr.mxu1 %v321_v16 }
  0xf9   : > { %v929_v18 = vpop.f32.mrf.mxu0  ;;  %946 = vmatpush3.msra.mxu1 %v321_v16 }
  0xfa   : > { %953 = vmatprep.subr.mxu0 %v929_v18  ;;  %941 = vmatmul.mubr.msk.f32.gmra.mxu1 %vm220_vm0, %v353_v17 }
  0xfb   : > { %v331_v19 = vpop.f32.mrf.mxu0  ;;  %954 = vmatpush3.msra.mxu0 %v929_v18  ;;  %947 = vmatprep.mubr.msk.f32.mxu1 %vm220_vm0, %v350_v10 }
  0xfc   : > { %955 = vmatprep.subr.mxu0 %v331_v19 }
  0xfd   : > { %956 = vmatpush3.msra.mxu0 %v331_v19  ;;  %v932_v20 = vpop.f32.mrf.mxu0 }
  0xfe   : > { %963 = vmatprep.subr.mxu1 %v932_v20  ;;  %948 = vmatmul.mubr.msk.f32.vlgmr.msra.gmra.mxu1 %vm220_vm0, %v351_v13 }
  0xff   : > { %v341_v21 = vpop.f32.mrf.mxu0  ;;  %964 = vmatpush3.msra.mxu1 %v932_v20  ;;  %950 = vmatprep.mubr.msk.f32.mxu1 %vm220_vm0, %v352_v14 }
 0x100   : > { %965 = vmatprep.subr.mxu1 %v341_v21  ;;  %958 = vmatmul.mubr.msk.f32.vlgmr.msra.gmra.mxu0 %vm220_vm0, %v351_v13 }
 0x101   : > { %966 = vmatpush3.msra.mxu1 %v341_v21  ;;  %960 = vmatprep.mubr.msk.f32.mxu0 %vm220_vm0, %v352_v14 }
 0x102   : > { %951 = vmatmul.mubr.msk.f32.gmra.mxu1 %vm220_vm0, %v353_v17 }
 0x103   : > { %967 = vmatprep.mubr.msk.f32.mxu1 %vm220_vm0, %v350_v10 }
 0x104   : > { %961 = vmatmul.mubr.msk.f32.gmra.mxu0 %vm220_vm0, %v353_v17 }
 0x106   : > { %968 = vmatmul.mubr.msk.f32.vlgmr.msra.gmra.mxu1 %vm220_vm0, %v351_v13 }
 0x107   : > { %970 = vmatprep.mubr.msk.f32.mxu1 %vm220_vm0, %v352_v14 }
 0x10a   : > { %971 = vmatmul.mubr.msk.f32.gmra.mxu1 %vm220_vm0, %v353_v17 }
 0x1b6   : > { %v939_v22 = vpop.f32.mrf.mxu1 }
 0x1b7   : > { %453 = vst.msk [vmem:[%s1310_s29 + $0x8] sm:$0xff] %vm451_vm1, %v939_v22 }
 0x1b8   : > { %v432_v23 = vpop.f32.mrf.mxu1 }
 0x1b9   : > { %452 = vst.msk [vmem:[%s1310_s29] sm:$0xff] %vm451_vm1, %v432_v23 }
 0x1ba   : > { %v942_v24 = vpop.f32.mrf.mxu1 }
 0x1bb   : > { %455 = vst.msk [vmem:[%s1310_s29 + $0x18] sm:$0xff] %vm451_vm1, %v942_v24 }
 0x1bc   : > { %v442_v25 = vpop.f32.mrf.mxu1 }
 0x1bd   : > { %454 = vst.msk [vmem:[%s1310_s29 + $0x10] sm:$0xff] %vm451_vm1, %v442_v25 }
 0x1be   : > { %v949_v26 = vpop.f32.mrf.mxu1 }
 0x1bf   : > { %857 = vst.msk [vmem:[%s1310_s29 + $0x28] sm:$0xff] %vm451_vm1, %v949_v26 }
 0x1c0   : > { %v522_v27 = vpop.f32.mrf.mxu1  ;;  %v959_v28 = vpop.f32.mrf.mxu0 }
 0x1c1   : > { %856 = vst.msk [vmem:[%s1310_s29 + $0x20] sm:$0xff] %vm451_vm1, %v522_v27  ;;  %865 = vst.msk [vmem:[%s1310_s29 + $0x48] sm:$0xff] %vm451_vm1, %v959_v28 }
 0x1c2   : > { %v952_v29 = vpop.f32.mrf.mxu1  ;;  %v612_v30 = vpop.f32.mrf.mxu0 }
 0x1c3   : > { %859 = vst.msk [vmem:[%s1310_s29 + $0x38] sm:$0xff] %vm451_vm1, %v952_v29  ;;  %864 = vst.msk [vmem:[%s1310_s29 + $0x40] sm:$0xff] %vm451_vm1, %v612_v30 }
 0x1c4   : > { %v532_v31 = vpop.f32.mrf.mxu1  ;;  %v962_v32 = vpop.f32.mrf.mxu0 }
 0x1c5   : > { %858 = vst.msk [vmem:[%s1310_s29 + $0x30] sm:$0xff] %vm451_vm1, %v532_v31  ;;  %867 = vst.msk [vmem:[%s1310_s29 + $0x58] sm:$0xff] %vm451_vm1, %v962_v32 }
 0x1c6   : > { %v969_v33 = vpop.f32.mrf.mxu1  ;;  %v622_v34 = vpop.f32.mrf.mxu0 }
 0x1c7   : > { %873 = vst.msk [vmem:[%s1310_s29 + $0x68] sm:$0xff] %vm451_vm1, %v969_v33  ;;  %866 = vst.msk [vmem:[%s1310_s29 + $0x50] sm:$0xff] %vm451_vm1, %v622_v34 }
 0x1c8   : > { %v702_v35 = vpop.f32.mrf.mxu1 }
 0x1c9   : > { %872 = vst.msk [vmem:[%s1310_s29 + $0x60] sm:$0xff] %vm451_vm1, %v702_v35 }
 0x1ca   : > { %v972_v36 = vpop.f32.mrf.mxu1 }
 0x1cb   : > { %875 = vst.msk [vmem:[%s1310_s29 + $0x78] sm:$0xff] %vm451_vm1, %v972_v36 }
 0x1cc   : > { %v712_v37 = vpop.f32.mrf.mxu1 }
 0x1cd   : > { %874 = vst.msk [vmem:[%s1310_s29 + $0x70] sm:$0xff] %vm451_vm1, %v712_v37 }
 0x1ce   : > { %1080 = shalt.err (!%p1077_p6)
}
 0x1cf   : > { %s1081_s11 = scalar_lea.hbm %s1345_s7, 2048  ;;  %s1085_s21 = scalar_lea.hbm %s1402_s3, 4096 }
 0x1d0   : > { %p1082_p7 = scmp.ne.s32.totalorder %s1345_s7, %s1081_s11  ;;  %p1086_p13 = scmp.lt.s32.totalorder %s1345_s7, %s1402_s3 }
 0x1d1   : > { %p1087_p2 = scmp.lt.s32.totalorder %s1085_s21, %s1081_s11 }
 0x1d2   : > { %p1083_p10 = pnand %p1082_p7, %p1226_p9 }
 0x1d3   : > { %p1088_p8 = por %p1087_p2, %p1086_p13 }
 0x1d4   : > { %p1084_p4 = pneg %p1083_p10 }
 0x1d6   : > { %p1089_p12 = pnand %p1088_p8, %p1084_p4 }
 0x1d8   : > { %1092 = shalt.err (!%p1089_p12)
}
 0x1d9   : > { %s1153_s29 = smov 128   ;;  %s1154_s30 = smov 8  }
 0x1da   : > { %975 = dma.vmem_to_hbm [thread:$0]  (%p1226_p9), %s1347_s4, 2048, %s1345_s7, %s727_s15, %s1153_s29, %s1153_s29, %s1154_s30  }
 0x1db PF: > { %s758_s5 = sand.u32 1, %s1127_s12   ;;  %p1408_p0 = scmp.ge.s32.totalorder %s1147_s17, 2 }
 0x1dc   : > { %s759_s6 = scalar_lea.sflag [#allocation4], %s758_s5 }
 0x1dd   : > { %p982_p1 = pnand %p1408_p0, %p1233_p11 }
 0x1df   : > { %p983_p3 = pneg %p982_p1 }
 0x1e1   : > { %1122 = dma.done.wait (%p983_p3), %s759_s6, 2048  }
 0x1e2   : > { %1124 = vsyncadd (%p983_p3), %s759_s6, 4294965248  ;;  %s19_s17 = sadd.s32 1, %s1147_s17   ;;  %s1409_s12 = smov %s1131_s13 }
 0x1e3   : > { %p16_p5 = scmp.ge.s32.totalorder %s19_s17, 4   ;;  %s1410_s13 = smov %s1135_s14 }
 0x1e4   : > { %s1411_s14 = smov %s1231_s26  ;;  %s1412_s15 = smov %s1143_s16 }
 0x1e5   : > { %s1413_s16 = smov %s1415_s20  ;;  %18 = sbr.rel (!%p16_p5) target bundleno = 6 (0x6), region = 80 }
 0x1ea   :  { %764 = vsyncpa [#allocation3], 1 }
 0x1eb   :  { %766 = vsyncpa [#allocation3 + $0x1], 1 }
 0x1ec   :  { %767 = vsyncpa [#allocation4], 1 }
 0x1ed   :  { %769 = vsyncpa [#allocation4 + $0x1], 1 }

</bundles_post_ra>
